<compile_context>
chip_gen: v7x
topology: tpu7x:2x2x1
jax: 0.10.0
libtpu: 0.0.40
codegen_flags: <defaults>
</compile_context>

<pallas_src>
import jax
import jax.numpy as jnp
from jax.experimental import pallas as pl
from jax.experimental.pallas import tpu as pltpu

LANE = 128            # vreg lane width (last dim of every block)
SUBL = 8              # f32 sublane count (accumulator row count)
MAX_BLOCK_ROWS = 8192  # (8192, 128) f32 = 4 MiB per input per pipeline buffer


def _dice_sums_kernel(x_ref, y_ref, acc_ref):
    """Accumulate partial [sum(x*y), sum(x+y)] into a resident (1,2,8,128) block."""
    @pl.when(pl.program_id(1) == 0)
    def _init():
        acc_ref[...] = jnp.zeros_like(acc_ref)

    x = x_ref[...].astype(jnp.float32)
    y = y_ref[...].astype(jnp.float32)
    rows = x.shape[0]

    # Partial-reduce each (rows, 128) tile to one (8, 128) vreg block: the
    # reshape groups whole (8,128) tiles and the axis-0 sum is pure VPU vreg
    # adds (no XLU, no scalar path, no masking) -> stays hidden under the DMA.
    # TODO(synk): if bf16 inputs ever make this VALU-bound on v7x, offload the
    # row reduction to the MXU via jnp.dot(ones((8, rows)), ...).
    xy = (x * y).reshape(rows // SUBL, SUBL, LANE).sum(axis=0)
    xpy = (x + y).reshape(rows // SUBL, SUBL, LANE).sum(axis=0)

    acc_ref[0, 0] += xy
    acc_ref[0, 1] += xpy


def _sublane_packing(dtype) -> int:
    # Sublanes per vreg for this dtype: 32-bit -> 8, 16-bit -> 16, 8-bit -> 32.
    bits = jnp.dtype(dtype).itemsize * 8
    return max(SUBL, (32 // bits) * SUBL)


def _num_tensorcores() -> int:
    # 2 TensorCores per chip only on v7x; v5e/v6e have 1.
    try:
        kind = jax.devices()[0].device_kind.lower()
    except Exception:
        return 1
    return 2 if "v7" in kind else 1


def dice_loss(logits: jax.Array, labels: jax.Array) -> jax.Array:
    """1 - (2*sum(x*y) + eps) / (sum(x) + sum(y) + eps), eps = 1e-5."""
    smooth = 1e-05

    x = logits.reshape(-1)   # row-major flatten is free
    y = labels.reshape(-1)
    n = x.shape[0]

    packing = max(_sublane_packing(x.dtype), _sublane_packing(y.dtype))

    # --- ragged lane tail (n % 128 elements, usually 0): plain jnp.sum ------
    n_main = (n // LANE) * LANE
    tail_xy = jnp.float32(0.0)
    tail_xpy = jnp.float32(0.0)
    if n_main < n:
        tx = x[n_main:].astype(jnp.float32)
        ty = y[n_main:].astype(jnp.float32)
        tail_xy = tail_xy + jnp.sum(tx * ty)
        tail_xpy = tail_xpy + jnp.sum(tx) + jnp.sum(ty)

    if n_main == 0:
        # Degenerate (< 128 elements): nothing worth launching a kernel for.
        return 1.0 - (2.0 * tail_xy + smooth) / (tail_xpy + smooth)

    x2 = (x[:n_main] if n_main < n else x).reshape(-1, LANE)
    y2 = (y[:n_main] if n_main < n else y).reshape(-1, LANE)
    total_rows = x2.shape[0]

    # --- block size and (v7x only) a real 2-TensorCore split ----------------
    num_parts = 2 if (_num_tensorcores() == 2
                      and total_rows >= 2 * MAX_BLOCK_ROWS) else 1

    if total_rows >= num_parts * MAX_BLOCK_ROWS:
        block_rows = MAX_BLOCK_ROWS
    else:
        # Small input (single part): one block covering as many full
        # packing-aligned rows as possible.
        block_rows = (total_rows // packing) * packing

    if block_rows == 0:
        # Tiny input (< packing rows): pad rows with zeros up to one block.
        pad_rows = packing - total_rows
        x2 = jnp.pad(x2, ((0, pad_rows), (0, 0)))
        y2 = jnp.pad(y2, ((0, pad_rows), (0, 0)))
        total_rows = packing
        block_rows = packing

    steps = total_rows // (num_parts * block_rows)
    main_rows = num_parts * steps * block_rows

    # --- row tail not covered by full blocks: plain jnp.sum (<= few MiB) ----
    if main_rows < total_rows:
        tx = x2[main_rows:].astype(jnp.float32)
        ty = y2[main_rows:].astype(jnp.float32)
        tail_xy = tail_xy + jnp.sum(tx * ty)
        tail_xpy = tail_xpy + jnp.sum(tx) + jnp.sum(ty)

    def in_map(c, i):
        return (c * steps + i, 0)

    if num_parts == 2:
        part_sem = getattr(pltpu, "CORE_PARALLEL", "parallel")
    else:
        part_sem = "arbitrary"   # size-1 axis; semantics irrelevant

    partials = pl.pallas_call(
        _dice_sums_kernel,
        out_shape=jax.ShapeDtypeStruct((num_parts, 2, SUBL, LANE), jnp.float32),
        grid_spec=pltpu.PrefetchScalarGridSpec(
            num_scalar_prefetch=0,
            grid=(num_parts, steps),
            in_specs=[
                pl.BlockSpec((block_rows, LANE), in_map),
                pl.BlockSpec((block_rows, LANE), in_map),
            ],
            out_specs=pl.BlockSpec((1, 2, SUBL, LANE),
                                   lambda c, i: (c, 0, 0, 0)),
        ),
        compiler_params=pltpu.CompilerParams(
            dimension_semantics=(part_sem, "arbitrary"),
            vmem_limit_bytes=32 << 20,   # 16 MiB working set fits on all gens
        ),
    )(x2, y2)

    # Final tiny reduction of the per-part (8,128) partial-sum blocks (glue).
    inse = jnp.sum(partials[:, 0]) + tail_xy
    p_plus_g = jnp.sum(partials[:, 1]) + tail_xpy
    return 1.0 - (2.0 * inse + smooth) / (p_plus_g + smooth)


if __name__ == "__main__":
    key = jax.random.PRNGKey(0)
    k1, k2 = jax.random.split(key)

    # NCHW, matching the PyTorch convention for segmentation logits/labels.
    B, C, H, W = 2, 4, 16, 16
    logits = jax.nn.sigmoid(jax.random.normal(k1, (B, C, H, W), dtype=jnp.float32))
    labels = (jax.random.uniform(k2, (B, C, H, W)) > 0.5).astype(jnp.float32)

    loss = jax.jit(dice_loss)(logits, labels)
    loss = jax.block_until_ready(loss)

    # Pure-JAX reference (same math as the PyTorch module).
    smooth = 1e-05
    inse = jnp.sum(logits * labels)
    p = jnp.sum(logits)
    g = jnp.sum(labels)
    ref = 1.0 - (2.0 * inse + smooth) / (p + g + smooth)

    assert jnp.allclose(loss, ref, rtol=1e-5, atol=1e-6), (loss, ref)
    print("KERNEL_OK")
</pallas_src>

<mosaic_0001>
module attributes {stable_mosaic.version = 11 : i64} {
  func.func @_dice_sums_kernel(%arg0: i32, %arg1: i32, %arg2: memref<16x128xf32, #tpu.memory_space<vmem>>, %arg3: memref<16x128xf32, #tpu.memory_space<vmem>>, %arg4: memref<1x2x8x128xf32, #tpu.memory_space<vmem>>) attributes {dimension_semantics = [#tpu.dimension_semantics<arbitrary>, #tpu.dimension_semantics<arbitrary>], iteration_bounds = array<i64: 1, 1>, scalar_prefetch = 0 : i64, scratch_operands = 0 : i64, tpu.core_type = #tpu.core_type<tc>, window_params = [{transform_indices = @transform_0, window_bounds = array<i64: 16, 128>}, {transform_indices = @transform_1, window_bounds = array<i64: 16, 128>}, {transform_indices = @transform_2, window_bounds = array<i64: 1, 2, 8, 128>}]} {
    %c0_i32 = arith.constant 0 : i32
    %0 = arith.cmpi eq, %arg1, %c0_i32 : i32
    %1 = arith.extui %0 : i1 to i32
    %c0_i32_0 = arith.constant 0 : i32
    %2 = arith.cmpi ne, %1, %c0_i32_0 : i32
    scf.if %2 {
      %cst_20 = arith.constant 0.000000e+00 : f32
      %23 = vector.broadcast %cst_20 : f32 to vector<1x2x8x128xf32>
      %c0_21 = arith.constant 0 : index
      %c0_22 = arith.constant 0 : index
      %c0_23 = arith.constant 0 : index
      %c0_24 = arith.constant 0 : index
      %24 = vector.load %arg4[%c0_21, %c0_22, %c0_23, %c0_24] : memref<1x2x8x128xf32, #tpu.memory_space<vmem>>, vector<1x2x8x128xf32>
      tpu.vector_store %arg4[%c0_21, %c0_22, %c0_23, %c0_24], %23 {strides = array<i32>} : memref<1x2x8x128xf32, #tpu.memory_space<vmem>>, vector<1x2x8x128xf32>,
    } else {
    }
    %c0 = arith.constant 0 : index
    %c0_1 = arith.constant 0 : index
    %3 = vector.load %arg2[%c0, %c0_1] : memref<16x128xf32, #tpu.memory_space<vmem>>, vector<16x128xf32>
    %c0_2 = arith.constant 0 : index
    %c0_3 = arith.constant 0 : index
    %4 = vector.load %arg3[%c0_2, %c0_3] : memref<16x128xf32, #tpu.memory_space<vmem>>, vector<16x128xf32>
    %5 = arith.mulf %3, %4 : vector<16x128xf32>
    %6 = vector.shape_cast %5 : vector<16x128xf32> to vector<2x8x128xf32>
    %cst = arith.constant dense<0.000000e+00> : vector<8x128xf32>
    %7 = vector.multi_reduction <add>, %6, %cst [0] : vector<2x8x128xf32> to vector<8x128xf32>
    %8 = arith.addf %3, %4 : vector<16x128xf32>
    %9 = vector.shape_cast %8 : vector<16x128xf32> to vector<2x8x128xf32>
    %cst_4 = arith.constant dense<0.000000e+00> : vector<8x128xf32>
    %10 = vector.multi_reduction <add>, %9, %cst_4 [0] : vector<2x8x128xf32> to vector<8x128xf32>
    %c0_5 = arith.constant 0 : index
    %c0_6 = arith.constant 0 : index
    %c0_7 = arith.constant 0 : index
    %c0_8 = arith.constant 0 : index
    %11 = vector.load %arg4[%c0_5, %c0_6, %c0_7, %c0_8] : memref<1x2x8x128xf32, #tpu.memory_space<vmem>>, vector<1x1x8x128xf32>
    %12 = vector.shape_cast %11 : vector<1x1x8x128xf32> to vector<8x128xf32>
    %13 = arith.addf %12, %7 : vector<8x128xf32>
    %c0_9 = arith.constant 0 : index
    %c0_10 = arith.constant 0 : index
    %c0_11 = arith.constant 0 : index
    %c0_12 = arith.constant 0 : index
    %14 = vector.load %arg4[%c0_9, %c0_10, %c0_11, %c0_12] : memref<1x2x8x128xf32, #tpu.memory_space<vmem>>, vector<1x1x8x128xf32>
    %15 = vector.shape_cast %14 : vector<1x1x8x128xf32> to vector<8x128xf32>
    %16 = vector.shape_cast %13 : vector<8x128xf32> to vector<1x1x8x128xf32>
    tpu.vector_store %arg4[%c0_9, %c0_10, %c0_11, %c0_12], %16 {strides = array<i32>} : memref<1x2x8x128xf32, #tpu.memory_space<vmem>>, vector<1x1x8x128xf32>,
    %c0_13 = arith.constant 0 : index
    %c1 = arith.constant 1 : index
    %c0_14 = arith.constant 0 : index
    %c0_15 = arith.constant 0 : index
    %17 = vector.load %arg4[%c0_13, %c1, %c0_14, %c0_15] : memref<1x2x8x128xf32, #tpu.memory_space<vmem>>, vector<1x1x8x128xf32>
    %18 = vector.shape_cast %17 : vector<1x1x8x128xf32> to vector<8x128xf32>
    %19 = arith.addf %18, %10 : vector<8x128xf32>
    %c0_16 = arith.constant 0 : index
    %c1_17 = arith.constant 1 : index
    %c0_18 = arith.constant 0 : index
    %c0_19 = arith.constant 0 : index
    %20 = vector.load %arg4[%c0_16, %c1_17, %c0_18, %c0_19] : memref<1x2x8x128xf32, #tpu.memory_space<vmem>>, vector<1x1x8x128xf32>
    %21 = vector.shape_cast %20 : vector<1x1x8x128xf32> to vector<8x128xf32>
    %22 = vector.shape_cast %19 : vector<8x128xf32> to vector<1x1x8x128xf32>
    tpu.vector_store %arg4[%c0_16, %c1_17, %c0_18, %c0_19], %22 {strides = array<i32>} : memref<1x2x8x128xf32, #tpu.memory_space<vmem>>, vector<1x1x8x128xf32>,
    return
  }
  func.func @transform_0(%arg0: i32, %arg1: i32) -> (i32, i32) {
    %c1_i32 = arith.constant 1 : i32
    %0 = arith.muli %arg0, %c1_i32 : i32
    %1 = arith.addi %0, %arg1 : i32
    %c0_i32 = arith.constant 0 : i32
    %c0_i32_0 = arith.constant 0 : i32
    return %1, %c0_i32 : i32, i32
  }
  func.func @transform_1(%arg0: i32, %arg1: i32) -> (i32, i32) {
    %c1_i32 = arith.constant 1 : i32
    %0 = arith.muli %arg0, %c1_i32 : i32
    %1 = arith.addi %0, %arg1 : i32
    %c0_i32 = arith.constant 0 : i32
    %c0_i32_0 = arith.constant 0 : i32
    return %1, %c0_i32 : i32, i32
  }
  func.func @transform_2(%arg0: i32, %arg1: i32) -> (i32, i32, i32, i32) {
    %c0_i32 = arith.constant 0 : i32
    %c0_i32_0 = arith.constant 0 : i32
    %c0_i32_1 = arith.constant 0 : i32
    %c0_i32_2 = arith.constant 0 : i32
    return %arg0, %c0_i32, %c0_i32_0, %c0_i32_1 : i32, i32, i32, i32
  }
}

</mosaic_0001>

<bundles_post_ra>
// kernel: dice_loss.1
= control target key start
LH: loop header
LB: loop body
LE: loop exit
PB: predicated region body
PF: predicated region fallthrough
CT: control target
= control target key end

     0   :  { %s130_s0 = inlined_call_operand.vmem [shape: f32[16,128], index: 0, kind: input, shape index: {}]   ;;  %s131_s1 = inlined_call_operand.vmem [shape: f32[16,128], index: 1, kind: input, shape index: {}]   ;;  %s132_s2 = inlined_call_operand.vmem [shape: f32[1,2,8,128], index: 2, kind: output, shape index: {}]  }
   0x1   :  { %v61_v0 = vld [vmem:[%s130_s0] sm:$0xff]  ;;  %v62_v1 = vld [vmem:[%s130_s0 + $0x8] sm:$0xff] }
   0x2   :  { %v63_v2 = vld [vmem:[%s131_s1] sm:$0xff]  ;;  %v64_v3 = vld [vmem:[%s131_s1 + $0x8] sm:$0xff] }
   0x3   :  { %v65_v4 = vmul.f32 %v63_v2, %v61_v0  ;;  %v68_v5 = vadd.f32 %v63_v2, %v61_v0  ;;  %v66_v6 = vmul.f32 %v64_v3, %v62_v1  ;;  %v69_v7 = vadd.f32 %v64_v3, %v62_v1 }
   0x5   :  { %v67_v8 = vadd.f32 %v66_v6, %v65_v4  ;;  %v70_v9 = vadd.f32 %v69_v7, %v68_v5 }
   0x7   :  { %73 = vst [vmem:[%s132_s2] sm:$0xff] %v67_v8  ;;  %95 = vst [vmem:[%s132_s2 + $0x8] sm:$0xff] %v70_v9 }

</bundles_post_ra>
